<compile_context>
chip_gen: v7x
topology: tpu7x:2x2x1
jax: 0.10.0
libtpu: 0.0.40
codegen_flags: <defaults>
</compile_context>

<pallas_src>
import functools
import math

import jax
import jax.numpy as jnp
import numpy as np
from jax.experimental import pallas as pl
from jax.experimental.pallas import tpu as pltpu


def _round_up(n, m):
    return ((n + m - 1) // m) * m


def _cdiv(a, b):
    return -(-a // b)


def _eca_kernel_size(channels, gamma=2, b=1):
    t = int(abs((math.log(channels, 2) + b) / gamma))
    return t if t % 2 else t + 1


def _vmem_capacity_bytes():
    # Conservative (v7x-safe) fallback if the query is unavailable.
    try:
        return int(pltpu.get_tpu_info().vmem_capacity_bytes)
    except Exception:
        return 64 * 1024 * 1024


# --------------------- Fused single-pass kernel (pool+conv+sigmoid+scale) ---------------------

def _fused_kernel(x_ref, w_ref, o_ref, *, k, pad, c_true, c_pad):
    # x_ref/o_ref: (1, c_pad, HW) ; w_ref: (k,) f32 in SMEM (taps pre-scaled by 1/HW)
    xf = x_ref[0].astype(jnp.float32)                       # (c_pad, HW)
    pooled = jnp.sum(xf, axis=1, keepdims=True)             # (c_pad, 1); taps carry 1/HW

    ch = jax.lax.broadcasted_iota(jnp.int32, (c_pad, 1), 0)
    y = jnp.zeros((c_pad, 1), jnp.float32)
    for j in range(k):                                      # k tiny & static: unrolled
        shift = (pad - j) % c_pad                           # non-negative sublane roll
        rolled = pltpu.roll(pooled, shift, axis=0) if shift else pooled
        src = ch + (j - pad)                                # channel this tap reads
        valid = jnp.logical_and(src >= 0, src < c_true)     # Conv1d zero padding
        y = y + w_ref[j] * jnp.where(valid, rolled, 0.0)
    gate = jax.nn.sigmoid(y)                                # (c_pad, 1) f32

    o_ref[0] = x_ref[0] * gate.astype(o_ref.dtype)


# --------------------- Two-pass path, Kernel 1: streaming per-channel sums ---------------------

def _pool_kernel(x_ref, o_ref, *, hw_true, hw_tile, needs_mask):
    # x_ref: (1, c_pad, hw_tile) ; o_ref: (1, 1, c_pad, 1) f32 partial channel sums
    s = pl.program_id(1)
    t = pl.program_id(2)
    n_t = pl.num_programs(2)

    @pl.when(t == 0)
    def _init():
        o_ref[...] = jnp.zeros_like(o_ref)

    x = x_ref[0].astype(jnp.float32)                        # (c_pad, hw_tile)
    if needs_mask:
        start = (s * n_t + t) * hw_tile
        lane = jax.lax.broadcasted_iota(jnp.int32, x.shape, 1)
        x = jnp.where(start + lane < hw_true, x, 0.0)       # boundary / phantom tiles
    psum = jnp.sum(x, axis=1, keepdims=True)                # lane-axis reduce -> (c_pad, 1)
    o_ref[...] += psum.reshape(o_ref.shape)


# --------------------- Two-pass path, Kernel 2: streaming elementwise scale ---------------------

def _scale_kernel(x_ref, g_ref, o_ref):
    # x_ref/o_ref: (1, c_tile, hw_tile) ; g_ref: (1, c_tile, 1) f32
    o_ref[...] = x_ref[...] * g_ref[...].astype(x_ref.dtype)


# --------------------------------------- Wrapper ---------------------------------------

def eca_layer(x, weight_k, *, force_two_pass=False, max_block_bytes_override=None):
    """x: (B, C, H, W); weight_k: (k,) f32 Conv1d(1,1,k,bias=False) weight."""
    B, C, H, W = x.shape
    HW = H * W
    k = int(weight_k.shape[0])
    pad = (k - 1) // 2
    itemsize = np.dtype(x.dtype).itemsize
    w_f32 = weight_k.astype(jnp.float32).reshape(k)

    # ---- Generation-dependent budgets (v7x: 64 MiB VMEM; v5e/v6e: 128 MiB). ----
    vmem_cap = _vmem_capacity_bytes()
    if vmem_cap <= 64 * 1024 * 1024:                       # v7x-class (or unknown -> safe)
        max_block_bytes = 4 * 1024 * 1024
        stream_vmem_limit = 40 * 1024 * 1024
        fused_slab_limit = 6 * 1024 * 1024
        fused_vmem_limit = 48 * 1024 * 1024
    else:                                                  # v5e / v6e
        max_block_bytes = 8 * 1024 * 1024
        stream_vmem_limit = 64 * 1024 * 1024
        fused_slab_limit = 12 * 1024 * 1024
        fused_vmem_limit = 100 * 1024 * 1024
    if max_block_bytes_override is not None:               # testing hook
        max_block_bytes = int(max_block_bytes_override)

    # Channel padding only when C is not sublane-aligned (rare for CNN channel counts).
    # HW is never padded on the host.
    C_pad = _round_up(C, 8)
    x_flat = x.reshape(B, C, HW)
    if C_pad != C:
        x_flat = jnp.pad(x_flat, ((0, 0), (0, C_pad - C), (0, 0)))

    fused_slab_bytes = C_pad * _round_up(HW, 128) * itemsize

    if (fused_slab_bytes <= fused_slab_limit) and not force_two_pass:
        # ---------------- Fused single-pass path ----------------
        w_scaled = w_f32 / float(HW)                       # fold mean into the taps
        out_flat = pl.pallas_call(
            functools.partial(_fused_kernel, k=k, pad=pad, c_true=C, c_pad=C_pad),
            out_shape=jax.ShapeDtypeStruct((B, C_pad, HW), x.dtype),
            grid_spec=pltpu.PrefetchScalarGridSpec(
                num_scalar_prefetch=0,
                grid=(B,),
                in_specs=[
                    pl.BlockSpec((1, C_pad, HW), lambda b: (b, 0, 0)),
                    pl.BlockSpec(memory_space=pltpu.MemorySpace.SMEM),
                ],
                out_specs=pl.BlockSpec((1, C_pad, HW), lambda b: (b, 0, 0)),
            ),
            compiler_params=pltpu.CompilerParams(
                dimension_semantics=("parallel",),
                vmem_limit_bytes=fused_vmem_limit,
            ),
            cost_estimate=pl.CostEstimate(
                flops=2 * B * C_pad * HW,
                transcendentals=B * C_pad,
                bytes_accessed=2 * B * C_pad * HW * itemsize + k * 4,
            ),
        )(x_flat, w_scaled)
    else:
        # ---------------- Two-pass streaming path ----------------
        # Kernel 1: per-channel partial sums; HW reduction split in two parallel
        # segments so both TensorCores stream even when B == 1.
        lane_budget1 = max(128, ((max_block_bytes // (C_pad * itemsize)) // 128) * 128)
        hw_tile1 = lane_budget1 if lane_budget1 < HW else HW
        n_hw1 = _cdiv(HW, hw_tile1)
        n_split = 2 if n_hw1 >= 2 else 1
        n_hw_ps = _cdiv(n_hw1, n_split)
        has_phantom = (n_split * n_hw_ps) > n_hw1
        needs_mask = has_phantom or (HW % hw_tile1 != 0)

        if has_phantom:
            def x1_map(b, s, t):
                return (b, 0, jnp.minimum(s * n_hw_ps + t, n_hw1 - 1))
        else:
            def x1_map(b, s, t):
                return (b, 0, s * n_hw_ps + t)

        psums = pl.pallas_call(
            functools.partial(_pool_kernel, hw_true=HW, hw_tile=hw_tile1,
                              needs_mask=needs_mask),
            out_shape=jax.ShapeDtypeStruct((B, n_split, C_pad, 1), jnp.float32),
            grid_spec=pltpu.PrefetchScalarGridSpec(
                num_scalar_prefetch=0,
                grid=(B, n_split, n_hw_ps),
                in_specs=[pl.BlockSpec((1, C_pad, hw_tile1), x1_map)],
                out_specs=pl.BlockSpec((1, 1, C_pad, 1), lambda b, s, t: (b, s, 0, 0)),
            ),
            compiler_params=pltpu.CompilerParams(
                dimension_semantics=("parallel", "parallel", "arbitrary"),
                vmem_limit_bytes=stream_vmem_limit,
            ),
            cost_estimate=pl.CostEstimate(
                flops=B * C_pad * HW,
                transcendentals=0,
                bytes_accessed=B * C_pad * HW * itemsize + B * n_split * C_pad * 4,
            ),
        )(x_flat)

        # Tiny O(B*C) JAX epilogue: mean, k-tap channel conv, sigmoid.
        pooled = jnp.sum(psums[:, :, :C, 0], axis=1) / float(HW)     # (B, C)
        pooled_pad = jnp.pad(pooled, ((0, 0), (pad, pad)))
        y = jnp.zeros((B, C), jnp.float32)
        for j in range(k):
            y = y + w_f32[j] * pooled_pad[:, j:j + C]
        gate = jax.nn.sigmoid(y)                                     # (B, C) f32
        if C_pad != C:
            gate = jnp.pad(gate, ((0, 0), (0, C_pad - C)))
        gate = gate[:, :, None]                                      # (B, C_pad, 1)

        # Kernel 2: streaming x * gate.  Lane budget derived from c_tile (not C_pad)
        # so blocks stay ~max_block_bytes even for large C.
        c_tile = C_pad
        if C_pad > 512:
            for cand in (512, 384, 256, 128, 64, 32, 16, 8):
                if C_pad % cand == 0:
                    c_tile = cand
                    break
        lane_budget2 = max(128, ((max_block_bytes // (c_tile * itemsize)) // 128) * 128)
        hw_tile2 = lane_budget2 if lane_budget2 < HW else HW
        n_hw2 = _cdiv(HW, hw_tile2)
        n_c = C_pad // c_tile

        out_flat = pl.pallas_call(
            _scale_kernel,
            out_shape=jax.ShapeDtypeStruct((B, C_pad, HW), x.dtype),
            grid_spec=pltpu.PrefetchScalarGridSpec(
                num_scalar_prefetch=0,
                grid=(B, n_c, n_hw2),
                in_specs=[
                    pl.BlockSpec((1, c_tile, hw_tile2), lambda b, ci, ti: (b, ci, ti)),
                    pl.BlockSpec((1, c_tile, 1), lambda b, ci, ti: (b, ci, 0)),
                ],
                out_specs=pl.BlockSpec((1, c_tile, hw_tile2),
                                       lambda b, ci, ti: (b, ci, ti)),
            ),
            compiler_params=pltpu.CompilerParams(
                dimension_semantics=("parallel", "parallel", "parallel"),
                vmem_limit_bytes=stream_vmem_limit,
            ),
            cost_estimate=pl.CostEstimate(
                flops=B * C_pad * HW,
                transcendentals=0,
                bytes_accessed=2 * B * C_pad * HW * itemsize + B * C_pad * 4,
            ),
        )(x_flat, gate)

    if C_pad != C:
        out_flat = out_flat[:, :C, :]
    return out_flat.reshape(B, C, H, W)


# --------------------------------------- Reference ---------------------------------------

def _eca_reference(x, weight_k):
    """Pure-JAX reference mirroring the PyTorch forward exactly."""
    B, C, H, W = x.shape
    k = weight_k.shape[0]
    pad = (k - 1) // 2
    pooled = jnp.mean(x.astype(jnp.float32), axis=(2, 3))            # (B, C)
    pooled_pad = jnp.pad(pooled, ((0, 0), (pad, pad)))
    y = jnp.zeros((B, C), jnp.float32)
    for j in range(k):
        y = y + weight_k[j] * pooled_pad[:, j:j + C]
    y = jax.nn.sigmoid(y)
    return x * y[:, :, None, None].astype(x.dtype)


if __name__ == "__main__":
    def _run_case(idx, B, C, H, W, force_two_pass=False, max_block_bytes=None):
        k = _eca_kernel_size(C)                                      # matches PyTorch __init__
        key = jax.random.fold_in(jax.random.PRNGKey(0), idx)
        kx, kw = jax.random.split(key)
        x = jax.random.normal(kx, (B, C, H, W), dtype=jnp.float32)
        # Deterministic synthetic Conv1d(1,1,k,bias=False) weight; PyTorch (1,1,k) -> flat (k,)
        weight_k = jax.random.normal(kw, (k,), dtype=jnp.float32) * 0.5
        out = jax.block_until_ready(
            eca_layer(x, weight_k, force_two_pass=force_two_pass,
                      max_block_bytes_override=max_block_bytes))
        ref = _eca_reference(x, weight_k)
        np.testing.assert_allclose(np.asarray(out), np.asarray(ref), rtol=1e-5, atol=1e-5)

    # Fused single-pass path.
    _run_case(0, 2, 16, 16, 16)                       # aligned C and lane-aligned HW
    _run_case(1, 2, 12, 10, 10)                       # unaligned C (channel pad) + unaligned HW
    # Two-pass streaming path (forced at small shapes so it is covered too).
    _run_case(2, 2, 16, 16, 16, force_two_pass=True)
    _run_case(3, 2, 12, 10, 10, force_two_pass=True)
    # Tiny tile override: exercises the B=1 HW split, in-kernel lane masking and
    # partial boundary blocks of the streaming path (with and without phantom tiles).
    _run_case(4, 1, 16, 40, 40, force_two_pass=True, max_block_bytes=32 * 1024)
    _run_case(5, 1, 16, 30, 40, force_two_pass=True, max_block_bytes=32 * 1024)
    print("KERNEL_OK")
</pallas_src>

<mosaic_0001>
module attributes {stable_mosaic.version = 11 : i64} {
  func.func @_fused_kernel(%arg0: i32, %arg1: memref<1x16x256xf32, #tpu.memory_space<vmem>>, %arg2: memref<3xf32, #tpu.memory_space<smem>>, %arg3: memref<1x16x256xf32, #tpu.memory_space<vmem>>) attributes {dimension_semantics = [#tpu.dimension_semantics<parallel>], iteration_bounds = array<i64: 2>, scalar_prefetch = 0 : i64, scratch_operands = 0 : i64, tpu.core_type = #tpu.core_type<tc>, window_params = [{transform_indices = @transform_0, window_bounds = array<i64: 1, 16, 256>}, {transform_indices = @transform_1, window_bounds = array<i64: 3>}, {transform_indices = @transform_2, window_bounds = array<i64: 1, 16, 256>}]} {
    %c0 = arith.constant 0 : index
    %c0_0 = arith.constant 0 : index
    %c0_1 = arith.constant 0 : index
    %0 = vector.load %arg1[%c0, %c0_0, %c0_1] : memref<1x16x256xf32, #tpu.memory_space<vmem>>, vector<1x16x256xf32>
    %1 = vector.shape_cast %0 : vector<1x16x256xf32> to vector<16x256xf32>
    %cst = arith.constant dense<0.000000e+00> : vector<16xf32>
    %2 = vector.multi_reduction <add>, %1, %cst [1] : vector<16x256xf32> to vector<16xf32>
    %3 = vector.shape_cast %2 : vector<16xf32> to vector<16x1xf32>
    %4 = tpu.iota {dimensions = array<i32: 0>} : vector<16x1xi32>
    %cst_2 = arith.constant 0.000000e+00 : f32
    %5 = vector.broadcast %cst_2 : f32 to vector<16x1xf32>
    %c1_i32 = arith.constant 1 : i32
    %6 = tpu.dynamic_rotate %3 by %c1_i32 dim 0 : vector<16x1xf32>, i32 -> vector<16x1xf32>
    %c-1_i32 = arith.constant -1 : i32
    %7 = vector.broadcast %c-1_i32 : i32 to vector<16x1xi32>
    %8 = arith.addi %4, %7 : vector<16x1xi32>
    %c0_i32 = arith.constant 0 : i32
    %9 = vector.broadcast %c0_i32 : i32 to vector<16x1xi32>
    %10 = arith.cmpi sge, %8, %9 : vector<16x1xi32>
    %c16_i32 = arith.constant 16 : i32
    %11 = vector.broadcast %c16_i32 : i32 to vector<16x1xi32>
    %12 = arith.cmpi slt, %8, %11 : vector<16x1xi32>
    %13 = arith.andi %10, %12 : vector<16x1xi1>
    %c0_3 = arith.constant 0 : index
    %14 = memref.load %arg2[%c0_3] : memref<3xf32, #tpu.memory_space<smem>>
    %cst_4 = arith.constant 0.000000e+00 : f32
    %15 = vector.broadcast %cst_4 : f32 to vector<16x1xf32>
    %16 = arith.select %13, %6, %15 : vector<16x1xi1>, vector<16x1xf32>
    %17 = vector.broadcast %14 : f32 to vector<16x1xf32>
    %18 = arith.mulf %17, %16 : vector<16x1xf32>
    %19 = arith.addf %5, %18 : vector<16x1xf32>
    %c0_i32_5 = arith.constant 0 : i32
    %20 = vector.broadcast %c0_i32_5 : i32 to vector<16x1xi32>
    %21 = arith.addi %4, %20 : vector<16x1xi32>
    %c0_i32_6 = arith.constant 0 : i32
    %22 = vector.broadcast %c0_i32_6 : i32 to vector<16x1xi32>
    %23 = arith.cmpi sge, %21, %22 : vector<16x1xi32>
    %c16_i32_7 = arith.constant 16 : i32
    %24 = vector.broadcast %c16_i32_7 : i32 to vector<16x1xi32>
    %25 = arith.cmpi slt, %21, %24 : vector<16x1xi32>
    %26 = arith.andi %23, %25 : vector<16x1xi1>
    %c1 = arith.constant 1 : index
    %27 = memref.load %arg2[%c1] : memref<3xf32, #tpu.memory_space<smem>>
    %cst_8 = arith.constant 0.000000e+00 : f32
    %28 = vector.broadcast %cst_8 : f32 to vector<16x1xf32>
    %29 = arith.select %26, %3, %28 : vector<16x1xi1>, vector<16x1xf32>
    %30 = vector.broadcast %27 : f32 to vector<16x1xf32>
    %31 = arith.mulf %30, %29 : vector<16x1xf32>
    %32 = arith.addf %19, %31 : vector<16x1xf32>
    %c15_i32 = arith.constant 15 : i32
    %33 = tpu.dynamic_rotate %3 by %c15_i32 dim 0 : vector<16x1xf32>, i32 -> vector<16x1xf32>
    %c1_i32_9 = arith.constant 1 : i32
    %34 = vector.broadcast %c1_i32_9 : i32 to vector<16x1xi32>
    %35 = arith.addi %4, %34 : vector<16x1xi32>
    %c0_i32_10 = arith.constant 0 : i32
    %36 = vector.broadcast %c0_i32_10 : i32 to vector<16x1xi32>
    %37 = arith.cmpi sge, %35, %36 : vector<16x1xi32>
    %c16_i32_11 = arith.constant 16 : i32
    %38 = vector.broadcast %c16_i32_11 : i32 to vector<16x1xi32>
    %39 = arith.cmpi slt, %35, %38 : vector<16x1xi32>
    %40 = arith.andi %37, %39 : vector<16x1xi1>
    %c2 = arith.constant 2 : index
    %41 = memref.load %arg2[%c2] : memref<3xf32, #tpu.memory_space<smem>>
    %cst_12 = arith.constant 0.000000e+00 : f32
    %42 = vector.broadcast %cst_12 : f32 to vector<16x1xf32>
    %43 = arith.select %40, %33, %42 : vector<16x1xi1>, vector<16x1xf32>
    %44 = vector.broadcast %41 : f32 to vector<16x1xf32>
    %45 = arith.mulf %44, %43 : vector<16x1xf32>
    %46 = arith.addf %32, %45 : vector<16x1xf32>
    %47 = arith.negf %46 : vector<16x1xf32>
    %48 = math.exp %47 : vector<16x1xf32>
    %cst_13 = arith.constant 1.000000e+00 : f32
    %49 = vector.broadcast %cst_13 : f32 to vector<16x1xf32>
    %50 = arith.addf %49, %48 : vector<16x1xf32>
    %51 = arith.divf %49, %50 : vector<16x1xf32>
    %c0_14 = arith.constant 0 : index
    %c0_15 = arith.constant 0 : index
    %c0_16 = arith.constant 0 : index
    %52 = vector.load %arg1[%c0_14, %c0_15, %c0_16] : memref<1x16x256xf32, #tpu.memory_space<vmem>>, vector<1x16x256xf32>
    %53 = vector.shape_cast %52 : vector<1x16x256xf32> to vector<16x256xf32>
    %54 = vector.broadcast %51 : vector<16x1xf32> to vector<16x256xf32>
    %55 = arith.mulf %53, %54 : vector<16x256xf32>
    %c0_17 = arith.constant 0 : index
    %c0_18 = arith.constant 0 : index
    %c0_19 = arith.constant 0 : index
    %56 = vector.load %arg3[%c0_17, %c0_18, %c0_19] : memref<1x16x256xf32, #tpu.memory_space<vmem>>, vector<1x16x256xf32>
    %57 = vector.shape_cast %56 : vector<1x16x256xf32> to vector<16x256xf32>
    %58 = vector.shape_cast %55 : vector<16x256xf32> to vector<1x16x256xf32>
    tpu.vector_store %arg3[%c0_17, %c0_18, %c0_19], %58 {strides = array<i32>} : memref<1x16x256xf32, #tpu.memory_space<vmem>>, vector<1x16x256xf32>,
    return
  }
  func.func @transform_0(%arg0: i32) -> (i32, i32, i32) {
    %c0_i32 = arith.constant 0 : i32
    %c0_i32_0 = arith.constant 0 : i32
    %c0_i32_1 = arith.constant 0 : i32
    return %arg0, %c0_i32, %c0_i32_0 : i32, i32, i32
  }
  func.func @transform_1(%arg0: i32) -> i32 {
    %c0_i32 = arith.constant 0 : i32
    %c0_i32_0 = arith.constant 0 : i32
    return %c0_i32 : i32
  }
  func.func @transform_2(%arg0: i32) -> (i32, i32, i32) {
    %c0_i32 = arith.constant 0 : i32
    %c0_i32_0 = arith.constant 0 : i32
    %c0_i32_1 = arith.constant 0 : i32
    return %arg0, %c0_i32, %c0_i32_0 : i32, i32, i32
  }
}

</mosaic_0001>

<bundles_post_ra>
// kernel: tpu_custom_call.1
= control target key start
LH: loop header
LB: loop body
LE: loop exit
PB: predicated region body
PF: predicated region fallthrough
CT: control target
= control target key end

     0   :  { %7 = vsyncpa [#allocation3], 0  ;;  %s817_s0 = inlined_call_operand.hbm [shape: f32[2,16,256], index: 0, kind: input, shape index: {}]   ;;  %s818_s1 = inlined_call_operand.vmem [shape: f32[3], index: 1, kind: input, shape index: {}]   ;;  %s819_s2 = inlined_call_operand.hbm [shape: f32[2,16,256], index: 2, kind: output, shape index: {}]  }
   0x1   :  { %9 = vsyncpa [#allocation3 + $0x1], 0 }
   0x2   :  { %10 = vsyncpa [#allocation5], 0 }
   0x3   :  { %11 = vsyncpa [#allocation4], 0 }
   0x4   :  { %13 = vsyncpa [#allocation4 + $0x1], 0  ;;  %s608_s9 = smov 0   ;;  %s610_s10 = smov 0  }
   0x5   :  { %s612_s11 = smov 0   ;;  %s614_s12 = smov 0  }
   0x6 LB: > { %s629_s13 = sadd.s32 4294967295, %s583_s12   ;;  %s374_s14 = sadd.s32 4294967294, %s583_s12   ;;  %s583_s12 = sphi %s614_s12, %s839_s12   ;;  %s579_s11 = sphi %s612_s11, %s838_s11   ;;  %s575_s10 = sphi %s610_s10, %s837_s10   ;;  %s571_s9 = sphi %s608_s9, %s836_s9  }
   0x7   : > { %s633_s15 = sadd.s32 1, %s583_s12   ;;  %s26_s16 = sadd.s32 1, %s579_s11 }
   0x8   : > { %s23_s17 = ssub.s32 %s583_s12, %s633_s15  ;;  %p33_p0 = scmp.ne.s32.totalorder %s579_s11, %s575_s10 }
   0x9   : > { %p24_p1 = scmp.eq.s32.totalorder %s23_s17, 0  ;;  %p34_p2 = scmp.eq.s32.totalorder %s583_s12, 0 }
   0xa   : > { %p39_p3 = scmp.ne.s32.totalorder %s575_s10, %s571_s9  ;;  %p821_p4 = scmp.eq.s32.totalorder %s629_s13, 0 }
   0xb   : > { %s645_s18 = scalar_select %p24_p1, %s579_s11, %s26_s16  }
   0xc   : > { %p647_p5 = por %p34_p2, %p33_p0  ;;  %p653_p6 = por %p821_p4, %p39_p3 }
   0xd   : > { %p84_p7 = scmp.eq.s32.totalorder %s629_s13, 1  ;;  %p90_p8 = scmp.eq.s32.totalorder %s374_s14, 1 }
   0xe   : > { %s824_s20 = scalar_select %p653_p6, 1, 0 }
   0xf   : > { %p375_p9 = scmp.ge.s32.totalorder %s583_s12, 1  ;;  %p97_p10 = scmp.lt.s32.totalorder %s583_s12, 3 }
  0x10   : > { %p660_p11 = por %p84_p7, %p33_p0  ;;  %p664_p12 = por %p90_p8, %p39_p3 }
  0x11   : > { %p668_p13 = pnand %p375_p9, %p97_p10  ;;  %s110_s26 = sshll.u32 %s818_s1, 4  ;;  %s111_s26 = int_to_ptr.vmem [resolvable:$true] %s110_s26 }
  0x12   : > { %s825_s21 = scalar_select %p660_p11, 1, 0 }
  0x13   : > { %s826_s22 = scalar_select %p664_p12, 1, 0 }
  0x14   : > { %p404_p1 = pneg %p668_p13  ;;  %p417_p2 = scmp.lt.s32.totalorder %s583_s12, 2 }
  0x15   : > { %s121_s28 = sand.u32 1, %s579_s11   ;;  %s468_s3 = scalar_lea.vmem %s111_s26, 16 }
  0x16   : > { %p681_p7 = pnand %p404_p1, %p821_p4  ;;  %p688_p3 = pnand %p417_p2, %p647_p5 }
  0x17   : > { %s378_s30 = sshll.u32 %s121_s28, 5  ;;  %p469_p8 = scmp.ne.s32.totalorder %s111_s26, %s468_s3 }
  0x18   : > { %p470_p9 = pneg %p681_p7  ;;  %p476_p12 = scmp.lt.s32.totalorder %s111_s26, %s111_s26 }
  0x19   : > { %p477_p11 = scmp.lt.s32.totalorder %s468_s3, %s468_s3 }
  0x1a   : > { %p471_p10 = pnand %p470_p9, %p469_p8 }
  0x1b   : > { %p478_p1 = por %p477_p11, %p476_p12 }
  0x1c   : > { %p472_p0 = pneg %p471_p10 }
  0x1e   : > { %p479_p4 = pnand %p478_p1, %p472_p0 }
  0x20   : > { %482 = shalt.err (!%p479_p4)
}
  0x21   : > { %s585_s4 = smov [#allocation6]   ;;  %s394_s5 = sshll.u32 %s583_s12, 9 }
  0x22   : > { %407 = dma.vmem_to_smem (!%p681_p7), %s111_s26, 16, %s585_s4, [#allocation5]  }
  0x23   : > { %s125_s6 = scalar_lea.vmem [#allocation2], %s378_s30  ;;  %s700_s16 = scalar_lea.hbm %s817_s0, %s394_s5 }
  0x24   : > { %s132_s7 = sshll.u32 %s125_s6, 4  ;;  %s704_s17 = scalar_lea.sflag [#allocation3], %s121_s28  ;;  %s702_s7 = int_to_ptr.vmem [resolvable:$true] %s132_s7 }
  0x25   : > { %s483_s19 = scalar_lea.hbm %s700_s16, 512  ;;  %p485_p5 = pneg %p688_p3 }
  0x26   : > { %p484_p4 = scmp.ne.s32.totalorder %s700_s16, %s483_s19  ;;  %s488_s26 = scalar_lea.hbm %s817_s0, 1024 }
  0x27   : > { %p489_p0 = scmp.lt.u32.totalorder %s700_s16, %s817_s0  ;;  %p490_p2 = scmp.lt.u32.totalorder %s488_s26, %s483_s19 }
  0x28   : > { %p486_p11 = pnand %p485_p5, %p484_p4  ;;  %p492_p8 = scmp.lt.u32.totalorder %s483_s19, %s700_s16 }
  0x29   : > { %p491_p7 = por %p490_p2, %p489_p0 }
  0x2a   : > { %p487_p12 = pneg %p486_p11 }
  0x2b   : > { %p493_p9 = por %p492_p8, %p491_p7 }
  0x2d   : > { %p494_p10 = pnand %p493_p9, %p487_p12 }
  0x2f   : > { %497 = shalt.err (!%p494_p10)
}
  0x30   : > { %s498_s28 = scalar_lea.vmem %s702_s7, 512  ;;  %s586_s3 = smov [#allocation2]  }
  0x31   : > { %p499_p1 = scmp.ne.s32.totalorder %s702_s7, %s498_s28  ;;  %s503_s4 = sshll.u32 %s586_s3, 4  ;;  %s504_s4 = int_to_ptr.vmem [resolvable:$false] %s503_s4 }
  0x32   : > { %s505_s5 = scalar_lea.vmem %s504_s4, 1024  ;;  %p506_p6 = scmp.lt.s32.totalorder %s702_s7, %s504_s4 }
  0x33   : > { %p501_p4 = pnand %p499_p1, %p485_p5  ;;  %p507_p0 = scmp.lt.s32.totalorder %s505_s5, %s498_s28 }
  0x35   : > { %p502_p11 = pneg %p501_p4  ;;  %p508_p2 = por %p507_p0, %p506_p6 }
  0x37   : > { %p509_p7 = pnand %p508_p2, %p502_p11 }
  0x39   : > { %512 = shalt.err (!%p509_p7)
}
  0x3a   : > { %s587_s6 = smov 256   ;;  %s588_s8 = smov 16  }
  0x3b   : > { %411 = dma.hbm_to_vmem [thread:$0]  (!%p688_p3), %s700_s16, 512, %s702_s7, %s704_s17, %s587_s6, %s587_s6, %s588_s8  }
  0x3c   : > { %144 = sbr.rel (%p668_p13) target bundleno = 408 (0x198), region = 28  ;;  %s735_s14 = sand.u32 (!%p668_p13), 1, %s575_s10  }
  0x3d   : > { %s382_s19 = sshll.u32 (!%p668_p13), %s735_s14, 5  ;;  %s147_s24 = scalar_lea.sflag (!%p668_p13), [#allocation3], %s735_s14 }
  0x3e   : > { %s150_s25 = scalar_lea.vmem (!%p668_p13), [#allocation2], %s382_s19  ;;  %p830_p6 = scmp.ne.s32.totalorder (!%p668_p13), %s824_s20, 0 }
  0x43   : > { %558 = dma.done.wait (%p830_p6), %s147_s24, 512  }
  0x44   : > { %560 = vsyncadd (%p830_p6), %s147_s24, 4294966784  ;;  %p831_p3 = scmp.eq.s32.totalorder %s629_s13, 0 }
  0x46   : > { %562 = dma.done.wait (%p831_p3), [#allocation5], 16   ;;  %p832_p13 = pmov %p831_p3 }
  0x48   : > { %564 = vsyncadd (%p832_p13), [#allocation5], 4294967280 }
  0x49   : > { %159 = sfence }
  0x4a   : > { %v749_v0 = vld [vmem:[%s150_s25] sm:$0xff]  ;;  %v751_v1 = vld [vmem:[%s150_s25 + $0x8] sm:$0xff]  ;;  %v753_v2 = vld [vmem:[%s150_s25 + $0x10] sm:$0xff]  ;;  %v589_v6 = vmov 0   ;;  %v186_v7 = vlaneseq  ;;  %s202_s20 = sld [smem:[#allocation6]]  ;;  %s385_s23 = sld [smem:[#allocation6 + $0x1]] }
  0x4b   : > { %v180_v3 = vadd.f32 %v751_v1, %v749_v0  ;;  %v757_v4 = vld [vmem:[%s150_s25 + $0x18] sm:$0xff]  ;;  %458 = vset.pattern.permute.xlu1 %v589_v6  ;;  %459 = vset.pattern.permute.xlu0 %v589_v6  ;;  %s386_s29 = sld [smem:[#allocation6 + $0x2]]  ;;  %s175_s7 = scalar_lea.vmem [#allocation7], %s382_s19 }
  0x4c   : > { %v183_v5 = vadd.f32 %v757_v4, %v753_v2  ;;  %v187_v8 = vshrl.u32 %v186_v7, 7  ;;  %s289_s16 = sshll.u32 %s175_s7, 4  ;;  %s395_s17 = sshll.u32 %s629_s13, 9  ;;  %s766_s16 = int_to_ptr.vmem [resolvable:$true] %s289_s16 }
  0x4d   : > { %181 = vadd.xlane.f32.xlu0 %v180_v3  ;;  %s771_s30 = scalar_lea.hbm %s819_s2, %s395_s17  ;;  %s276_s13 = scalar_lea.sflag [#allocation4], %s735_s14 }
  0x4e   : > { %v188_v9 = vadd.s32 8, %v187_v8  ;;  %v194_v11 = vadd.s32 4294967295, %v187_v8  ;;  %vm191_vm0 = vcmp.lt.s32.totalorder %v187_v8, 1  ;;  %vm226_vm2 = vcmp.lt.s32.totalorder %v187_v8, 7  ;;  %s513_s28 = scalar_lea.vmem %s766_s16, 512  ;;  %p833_p12 = scmp.ne.s32.totalorder %s825_s21, 0 }
  0x4f   : > { %p514_p5 = scmp.ne.s32.totalorder %s766_s16, %s513_s28  ;;  %s590_s3 = smov [#allocation7]  }
  0x50   : > { %v230_v12 = vadd.s32 1, %v188_v9  ;;  %vm196_vm1 = vcmp.ge.s32.totalorder %v194_v11, 0  ;;  %v205_v13 = vstv %s202_s20  ;;  %v219_v19 = vstv %s385_s23  ;;  %s517_s4 = sshll.u32 %s590_s3, 4  ;;  %s518_s4 = int_to_ptr.vmem [resolvable:$false] %s517_s4 }
  0x51   : > { %184 = vadd.xlane.f32.xlu0 %v183_v5  ;;  %v240_v20 = vstv %s386_s29  ;;  %p515_p8 = pnand %p514_p5, %p833_p12  ;;  %s519_s5 = scalar_lea.vmem %s518_s4, 1024 }
  0x52   : > { %vm234_vm3 = vcmp.lt.s32.totalorder %v230_v12, 16  ;;  %p520_p10 = scmp.lt.s32.totalorder %s766_s16, %s518_s4  ;;  %p521_p1 = scmp.lt.s32.totalorder %s519_s5, %s513_s28 }
  0x53   : > { %p516_p9 = pneg %p515_p8 }
  0x54   : > { %p522_p4 = por %p521_p1, %p520_p10 }
  0x56   : > { %p523_p11 = pnand %p522_p4, %p516_p9 }
  0xda   : > { %v182_v10 = vpop.xlane.xlu0 %181 }
  0xdb   : > { %v189_v15 = vrot.slane %v182_v10, 7  ;;  %v224_v16 = vrot.slane %v182_v10, 1  ;;  %v220_v29 = vmul.f32 %v219_v19, %v182_v10 }
  0xde   : > { %v185_v14 = vpop.xlane.xlu0 %184 }
  0xdf   : > { %v190_v17 = vrot.slane %v185_v14, 7  ;;  %v225_v18 = vrot.slane %v185_v14, 1  ;;  %v221_v23 = vmul.f32 %v219_v19, %v185_v14 }
  0xe1   : > { %v192_v21 = vsel %vm191_vm0, %v189_v15, %v190_v17  ;;  %v193_v22 = vsel %vm191_vm0, %v190_v17, %v189_v15  ;;  %v228_v24 = vsel %vm226_vm2, %v225_v18, %v224_v16  ;;  %v227_v27 = vsel %vm226_vm2, %v224_v16, %v225_v18 }
  0xe2   : > { %v203_v25 = vsel %vm196_vm1, %v193_v22, 0.0  ;;  %v207_v26 = vmul.f32 %v205_v13, %v192_v21  ;;  %v239_v28 = vsel %vm234_vm3, %v228_v24, 0.0  ;;  %v241_v34 = vmul.f32 %v240_v20, %v227_v27 }
  0xe3   : > { %v206_v30 = vmul.f32 %v205_v13, %v203_v25  ;;  %v242_v31 = vmul.f32 %v240_v20, %v239_v28 }
  0xe4   : > { %v223_v32 = vadd.f32 %v221_v23, %v207_v26 }
  0xe5   : > { %v222_v33 = vadd.f32 %v220_v29, %v206_v30 }
  0xe6   : > { %v244_v35 = vadd.f32 %v242_v31, %v223_v32 }
  0xe7   : > { %v243_v36 = vadd.f32 %v241_v34, %v222_v33 }
  0xe8   : > { %v388_v37 = vmul.f32 -1.442695, %v244_v35 }
  0xe9   : > { %v387_v38 = vmul.f32 -1.442695, %v243_v36 }
  0xea   : > { %460 = vpow2.f32 %v388_v37 }
  0xeb   : > { %462 = vpow2.f32 %v387_v38 }
  0xf4   : > { %v461_v39 = vpop.eup %460 }
  0xf5   : > { %v463_v40 = vpop.eup %462  ;;  %v252_v42 = vadd.f32 1.0, %v461_v39 }
  0xf6   : > { %v251_v41 = vadd.f32 1.0, %v463_v40 }
  0xf8   : > { %464 = vrcp.f32 %v251_v41 }
  0xf9   : > { %466 = vrcp.f32 %v252_v42 }
 0x102   : > { %v465_v43 = vpop.eup %464 }
 0x103   : > { %259 = vperm.xlu1 %458, %v465_v43   ;;  %v467_v44 = vpop.eup %466 }
 0x107   : > { %264 = vperm.xlu1 %458, %v467_v44  }
 0x182   : > { %v260_v45 = vpop.permute.xlu1 %259 }
 0x183   : > { %v267_v46 = vmul.f32 %v260_v45, %v749_v0  ;;  %v268_v47 = vmul.f32 %v260_v45, %v751_v1 }
 0x185   : > { %271 = vst [vmem:[%s175_s7] sm:$0xff] %v267_v46  ;;  %272 = vst [vmem:[%s175_s7 + $0x8] sm:$0xff] %v268_v47 }
 0x186   : > { %v265_v48 = vpop.permute.xlu1 %264 }
 0x187   : > { %v269_v49 = vmul.f32 %v265_v48, %v753_v2  ;;  %v270_v50 = vmul.f32 %v265_v48, %v757_v4 }
 0x189   : > { %273 = vst [vmem:[%s175_s7 + $0x10] sm:$0xff] %v269_v49  ;;  %274 = vst [vmem:[%s175_s7 + $0x18] sm:$0xff] %v270_v50 }
 0x18a   : > { %526 = shalt.err (!%p523_p11)
}
 0x18b   : > { %s527_s6 = scalar_lea.hbm %s771_s30, 512  ;;  %s531_s24 = scalar_lea.hbm %s819_s2, 1024 }
 0x18c   : > { %p528_p0 = scmp.ne.s32.totalorder %s771_s30, %s527_s6  ;;  %p532_p6 = scmp.lt.u32.totalorder %s771_s30, %s819_s2 }
 0x18d   : > { %p533_p3 = scmp.lt.u32.totalorder %s531_s24, %s527_s6  ;;  %p535_p5 = scmp.lt.u32.totalorder %s527_s6, %s771_s30 }
 0x18e   : > { %p529_p2 = pnand %p528_p0, %p833_p12 }
 0x18f   : > { %p534_p13 = por %p533_p3, %p532_p6 }
 0x190   : > { %p530_p7 = pneg %p529_p2 }
 0x191   : > { %p536_p8 = por %p535_p5, %p534_p13 }
 0x193   : > { %p537_p9 = pnand %p536_p8, %p530_p7 }
 0x195   : > { %540 = shalt.err (!%p537_p9)
}
 0x196   : > { %s591_s23 = smov 256   ;;  %s592_s29 = smov 16  }
 0x197   : > { %402 = dma.vmem_to_hbm [thread:$0]  (%p833_p12), %s766_s16, 512, %s771_s30, %s276_s13, %s591_s23, %s591_s23, %s592_s29  }
 0x198 PF: > { %s304_s7 = sand.u32 1, %s571_s9   ;;  %p834_p10 = scmp.ne.s32.totalorder %s826_s22, 0 }
 0x199   : > { %p835_p1 = scmp.ge.s32.totalorder %s583_s12, 2  ;;  %s305_s17 = scalar_lea.sflag [#allocation4], %s304_s7 }
 0x19b   : > { %p413_p4 = pnand %p835_p1, %p834_p10 }
 0x19d   : > { %566 = dma.done.wait (!%p413_p4), %s305_s17, 512  }
 0x19e   : > { %568 = vsyncadd (!%p413_p4), %s305_s17, 4294966784  ;;  %p16_p11 = scmp.ge.s32.totalorder %s633_s15, 4   ;;  %s836_s9 = smov %s575_s10 }
 0x19f   : > { %s837_s10 = smov %s579_s11  ;;  %s838_s11 = smov %s645_s18 }
 0x1a0   : > { %s839_s12 = smov %s633_s15  ;;  %18 = sbr.rel (!%p16_p11) target bundleno = 6 (0x6), region = 78 }
 0x1a7   :  { %310 = vsyncpa [#allocation3], 1 }
 0x1a8   :  { %312 = vsyncpa [#allocation3 + $0x1], 1 }
 0x1a9   :  { %313 = vsyncpa [#allocation4], 1 }
 0x1aa   :  { %315 = vsyncpa [#allocation4 + $0x1], 1 }
 0x1ab   :  { %316 = vsyncpa [#allocation5], 1 }
 0x1ac   :  { %318 = vsyncpa [#allocation5 + $0x1], 1 }

</bundles_post_ra>
